<compile_context>
chip_gen: v6e
topology: v6e:2x2x1
jax: 0.10.0
libtpu: 0.0.40
codegen_flags: <defaults>
</compile_context>

<pallas_src>
import functools
import math

import jax
import jax.numpy as jnp
from jax.experimental import pallas as pl
from jax.experimental.pallas import tpu as pltpu

_NEG = -1e30   # exp(_NEG) == 0.0 : filler for (rare) flat-length padding
_EPS = 1e-10


def _infonce_kernel(mask_ref, corr_ref, loss_ref, pos_ref, tot_ref, *,
                    num_corr, chunk_rows, num_chunks):
    """Grid = (batch, row_tiles). Each step: one (rows_per_block, Cw) slab of one
    sample. pos/tot partials live in VMEM scratch across the (arbitrary) row axis."""
    l = pl.program_id(1)

    @pl.when(l == 0)
    def _init():
        pos_ref[...] = jnp.zeros_like(pos_ref)
        tot_ref[...] = jnp.zeros_like(tot_ref)

    cw = corr_ref.shape[-1]      # lane width: multiple of 128, num_corr | cw
    mw = mask_ref.shape[-1]      # cells per row == cw // num_corr

    # Exact 0/1 expansion matrix: expand[j, c] = 1 iff c // K == j.
    # Built once per grid step (hoisted out of the chunk loop).  Mask expansion
    # then runs on the idle MXU — the element-level mask never touches HBM.
    col = jax.lax.broadcasted_iota(jnp.int32, (mw, cw), 1)
    row = jax.lax.broadcasted_iota(jnp.int32, (mw, cw), 0)
    d = col - row * num_corr
    expand = ((d >= 0) & (d < num_corr)).astype(jnp.float32)        # (mw, cw)

    def body(i, carry):
        pos, tot = carry
        r0 = pl.multiple_of(i * chunk_rows, chunk_rows)
        # Only a chunk-sized f32 temporary is live (never the whole block).
        x = jnp.exp(corr_ref[0, pl.ds(r0, chunk_rows), :].astype(jnp.float32))
        m = mask_ref[0, pl.ds(r0, chunk_rows), :].astype(jnp.float32)
        # m_exp[r, c] = mask of the cell that lane c belongs to (exact 0/1 matmul).
        m_exp = jnp.dot(m, expand, preferred_element_type=jnp.float32)
        pos = pos + jnp.sum(jnp.sum(x * m_exp, axis=1, keepdims=True),
                            axis=0, keepdims=True)
        tot = tot + jnp.sum(jnp.sum(x, axis=1, keepdims=True),
                            axis=0, keepdims=True)
        return pos, tot

    pos, tot = jax.lax.fori_loop(0, num_chunks, body,
                                 (pos_ref[...], tot_ref[...]))
    pos_ref[...] = pos
    tot_ref[...] = tot

    @pl.when(l == pl.num_programs(1) - 1)
    def _finalize():
        inv_k = jnp.float32(1.0 / num_corr)
        p = pos_ref[...] * inv_k            # sum over K -> mean over K
        t = tot_ref[...] * inv_k            # == pos + neg
        loss_ref[0] = -jnp.log(p / (t + jnp.float32(_EPS)))


def _vmem_capacity_bytes():
    cap = 128 << 20
    try:
        cap = int(getattr(pltpu.get_tpu_info(), "vmem_capacity_bytes", cap))
    except Exception:
        pass
    return cap


def infonce_loss(corr_map, pt_map, density_map=None, *, downsampling_rate=8):
    """Forward of InfoNCELoss. corr_map: (bs, h*w, K); pt_map: (bs, 1, H, W)."""
    del density_map                       # unused, exactly like the PyTorch module
    D = downsampling_rate
    bs, _, H, W = pt_map.shape
    h, w = H // D, W // D
    N = h * w
    K = corr_map.shape[-1]
    if corr_map.shape[0] != bs or corr_map.shape[1] != N:
        raise ValueError(f"corr_map {corr_map.shape} inconsistent with pt_map/{D}")
    L = N * K

    # ---- glue: pooled positive-cell mask (== conv2d(pt, ones(DxD), stride=D) != 0)
    pooled = (pt_map[:, 0, :h * D, :w * D].astype(jnp.float32)
              .reshape(bs, h, D, w, D).sum(axis=(2, 4)))
    mask_cells = (pooled != 0).reshape(bs, N).astype(jnp.int8)       # (bs, N) int8

    # ---- layout: per-sample lane-dense (R, Cw) view of the flattened corr.
    itemsize = jnp.dtype(corr_map.dtype).itemsize
    g = math.gcd(128, K)
    cw = (128 // g) * K                    # lcm(128, K): lanes dense, K | cw
    mw = cw // K                           # cells per row
    r = pl.cdiv(L, cw)                     # rows per sample

    # ---- generation-aware block sizing (double buffer + temporaries fit VMEM)
    vmem = _vmem_capacity_bytes()
    target_block = min(16 << 20, vmem // 8)      # ~16 MiB (128-MiB parts), ~8 MiB v7x
    max_rows = max(1, target_block // (cw * itemsize))

    if r <= max_rows:
        rb = r                              # single row tile per sample
    else:
        rb = 0
        start = (min(max_rows, r) // 8) * 8
        for cand in range(start, 7, -8):    # largest multiple-of-8 divisor of r
            if r % cand == 0:
                rb = cand
                break
        if rb == 0:                         # awkward r: round rows up instead
            rb = max(8, (max_rows // 8) * 8)
            r = pl.cdiv(r, rb) * rb
    num_row_tiles = r // rb
    l_pad = r * cw

    # inner chunk: ~256 KiB live f32 per chunk, chunk_rows divides rb
    rc_target = max(1, (256 << 10) // (cw * 4))
    chunk_rows = 1
    for cand in range(min(rb, rc_target), 0, -1):
        if rb % cand == 0:
            chunk_rows = cand
            break
    num_chunks = rb // chunk_rows

    corr_flat = corr_map.reshape(bs, L)
    if l_pad != L:                          # rare: pad with exp()==0 filler
        corr_flat = jnp.pad(corr_flat, ((0, 0), (0, l_pad - L)),
                            constant_values=_NEG)
        mask_cells = jnp.pad(mask_cells, ((0, 0), (0, l_pad // K - N)))
    corr3 = corr_flat.reshape(bs, r, cw)    # free reshape when unpadded
    mask3 = mask_cells.reshape(bs, r, mw)

    block_bytes = rb * cw * itemsize
    vmem_limit = int(min(vmem * 3 // 4,
                         max(48 << 20, 4 * block_bytes + (8 << 20))))

    kernel = functools.partial(_infonce_kernel, num_corr=K,
                               chunk_rows=chunk_rows, num_chunks=num_chunks)

    cost = pl.CostEstimate(
        flops=int(6 * bs * l_pad),
        transcendentals=int(bs * l_pad),
        bytes_accessed=int(bs * (l_pad * itemsize + r * mw + 4)),
    )

    per_sample = pl.pallas_call(
        kernel,
        out_shape=jax.ShapeDtypeStruct((bs, 1, 1), jnp.float32),
        grid_spec=pltpu.PrefetchScalarGridSpec(
            num_scalar_prefetch=0,
            grid=(bs, num_row_tiles),
            in_specs=[
                pl.BlockSpec((1, rb, mw), lambda b, l: (b, l, 0)),   # mask (int8)
                pl.BlockSpec((1, rb, cw), lambda b, l: (b, l, 0)),   # corr
            ],
            out_specs=pl.BlockSpec((1, 1, 1), lambda b, l: (b, 0, 0)),
            scratch_shapes=[pltpu.VMEM((1, 1), jnp.float32),         # pos
                            pltpu.VMEM((1, 1), jnp.float32)],        # pos + neg
        ),
        compiler_params=pltpu.CompilerParams(
            dimension_semantics=("parallel", "arbitrary"),
            vmem_limit_bytes=vmem_limit),
        cost_estimate=cost,
    )(mask3, corr3)

    # Batch mean over per-sample losses (no batch padding was introduced).
    return jnp.mean(per_sample[:, 0, 0])


def _reference(corr_map, pt_map, D):
    """Pure-JAX reference mirroring the PyTorch forward."""
    bs, _, H, W = pt_map.shape
    h, w = H // D, W // D
    pooled = (pt_map[:, 0, :h * D, :w * D].astype(jnp.float32)
              .reshape(bs, h, D, w, D).sum(axis=(2, 4)))
    mask = (pooled != 0).reshape(bs, h * w)
    corr = jnp.exp(corr_map.astype(jnp.float32)).mean(axis=-1)
    pos = jnp.sum(jnp.where(mask, corr, 0.0), axis=-1)
    neg = jnp.sum(jnp.where(mask, 0.0, corr), axis=-1)
    return jnp.mean(-jnp.log(pos / (neg + pos + _EPS)))


if __name__ == "__main__":
    key = jax.random.PRNGKey(0)
    k1, k2, k3 = jax.random.split(key, 3)

    bs, D = 2, 8            # small shapes: downsampling_rate=8
    H = W = 32
    h, w = H // D, W // D
    N, K = h * w, 32        # corr_map last dim (candidates per cell)

    corr_map = jax.random.normal(k1, (bs, N, K), dtype=jnp.float32)
    pt_map = (jax.random.uniform(k2, (bs, 1, H, W)) < 0.05).astype(jnp.float32)
    density_map = jax.random.normal(k3, (bs, 1, H, W), dtype=jnp.float32)

    loss = infonce_loss(corr_map, pt_map, density_map, downsampling_rate=D)
    loss = jax.block_until_ready(loss)

    ref = _reference(corr_map, pt_map, D)
    assert bool(jnp.isfinite(loss)), loss
    assert jnp.allclose(loss, ref, rtol=1e-3, atol=1e-3), (loss, ref)
    print("KERNEL_OK")
</pallas_src>

<mosaic_0001>
module attributes {stable_mosaic.version = 11 : i64} {
  func.func @_infonce_kernel(%arg0: i32, %arg1: i32, %arg2: memref<1x4x4xi8, #tpu.memory_space<vmem>>, %arg3: memref<1x4x128xf32, #tpu.memory_space<vmem>>, %arg4: memref<1x1x1xf32, #tpu.memory_space<vmem>>, %arg5: memref<1x1xf32, #tpu.memory_space<vmem>>, %arg6: memref<1x1xf32, #tpu.memory_space<vmem>>) attributes {dimension_semantics = [#tpu.dimension_semantics<parallel>, #tpu.dimension_semantics<arbitrary>], iteration_bounds = array<i64: 2, 1>, scalar_prefetch = 0 : i64, scratch_operands = 2 : i64, tpu.core_type = #tpu.core_type<tc>, window_params = [{transform_indices = @transform_0, window_bounds = array<i64: 1, 4, 4>}, {transform_indices = @transform_1, window_bounds = array<i64: 1, 4, 128>}, {transform_indices = @transform_2, window_bounds = array<i64: 1, 1, 1>}]} {
    %c0_i32 = arith.constant 0 : i32
    %0 = arith.cmpi eq, %arg1, %c0_i32 : i32
    %1 = arith.extui %0 : i1 to i32
    %c0_i32_0 = arith.constant 0 : i32
    %2 = arith.cmpi ne, %1, %c0_i32_0 : i32
    scf.if %2 {
      %cst_21 = arith.constant 0.000000e+00 : f32
      %44 = vector.broadcast %cst_21 : f32 to vector<1x1xf32>
      %c0_22 = arith.constant 0 : index
      %c0_23 = arith.constant 0 : index
      %45 = vector.load %arg5[%c0_22, %c0_23] : memref<1x1xf32, #tpu.memory_space<vmem>>, vector<1x1xf32>
      tpu.vector_store %arg5[%c0_22, %c0_23], %44 {strides = array<i32>} : memref<1x1xf32, #tpu.memory_space<vmem>>, vector<1x1xf32>,
      %cst_24 = arith.constant 0.000000e+00 : f32
      %46 = vector.broadcast %cst_24 : f32 to vector<1x1xf32>
      %c0_25 = arith.constant 0 : index
      %c0_26 = arith.constant 0 : index
      %47 = vector.load %arg6[%c0_25, %c0_26] : memref<1x1xf32, #tpu.memory_space<vmem>>, vector<1x1xf32>
      tpu.vector_store %arg6[%c0_25, %c0_26], %46 {strides = array<i32>} : memref<1x1xf32, #tpu.memory_space<vmem>>, vector<1x1xf32>,
    } else {
    }
    %3 = tpu.iota {dimensions = array<i32: 1>} : vector<4x128xi32>
    %4 = tpu.iota {dimensions = array<i32: 0>} : vector<4x128xi32>
    %c32_i32 = arith.constant 32 : i32
    %5 = vector.broadcast %c32_i32 : i32 to vector<4x128xi32>
    %6 = arith.muli %4, %5 : vector<4x128xi32>
    %7 = arith.subi %3, %6 : vector<4x128xi32>
    %c0_i32_1 = arith.constant 0 : i32
    %8 = vector.broadcast %c0_i32_1 : i32 to vector<4x128xi32>
    %9 = arith.cmpi sge, %7, %8 : vector<4x128xi32>
    %c32_i32_2 = arith.constant 32 : i32
    %10 = vector.broadcast %c32_i32_2 : i32 to vector<4x128xi32>
    %11 = arith.cmpi slt, %7, %10 : vector<4x128xi32>
    %12 = arith.andi %9, %11 : vector<4x128xi1>
    %13 = arith.extui %12 : vector<4x128xi1> to vector<4x128xi32>
    %14 = arith.sitofp %13 : vector<4x128xi32> to vector<4x128xf32>
    %c0 = arith.constant 0 : index
    %c0_3 = arith.constant 0 : index
    %15 = vector.load %arg5[%c0, %c0_3] : memref<1x1xf32, #tpu.memory_space<vmem>>, vector<1x1xf32>
    %c0_4 = arith.constant 0 : index
    %c0_5 = arith.constant 0 : index
    %16 = vector.load %arg6[%c0_4, %c0_5] : memref<1x1xf32, #tpu.memory_space<vmem>>, vector<1x1xf32>
    %c0_i32_6 = arith.constant 0 : i32
    %c4_i32 = arith.constant 4 : i32
    %17 = arith.muli %c0_i32_6, %c4_i32 : i32
    %18 = tpu.assume_multiple %17, 4 : i32
    %c0_7 = arith.constant 0 : index
    %19 = arith.index_cast %18 : i32 to index
    %c0_8 = arith.constant 0 : index
    %20 = vector.load %arg3[%c0_7, %19, %c0_8] : memref<1x4x128xf32, #tpu.memory_space<vmem>>, vector<1x4x128xf32>
    %21 = vector.shape_cast %20 : vector<1x4x128xf32> to vector<4x128xf32>
    %22 = math.exp %21 : vector<4x128xf32>
    %c0_9 = arith.constant 0 : index
    %23 = arith.index_cast %18 : i32 to index
    %c0_10 = arith.constant 0 : index
    %24 = vector.load %arg2[%c0_9, %23, %c0_10] : memref<1x4x4xi8, #tpu.memory_space<vmem>>, vector<1x4x4xi8>
    %25 = vector.shape_cast %24 : vector<1x4x4xi8> to vector<4x4xi8>
    %26 = arith.sitofp %25 : vector<4x4xi8> to vector<4x4xf32>
    %cst = arith.constant dense<0.000000e+00> : vector<4x128xf32>
    %27 = tpu.matmul %26, %14, %cst {dimension_numbers = #tpu.dot_dimension_numbers<[1], [0], [0], [1], [0, 0, 1, 1], [], []>} : vector<4x4xf32>, vector<4x128xf32>, vector<4x128xf32> -> vector<4x128xf32>
    %28 = arith.mulf %22, %27 : vector<4x128xf32>
    %cst_11 = arith.constant dense<0.000000e+00> : vector<4xf32>
    %29 = vector.multi_reduction <add>, %28, %cst_11 [1] : vector<4x128xf32> to vector<4xf32>
    %30 = vector.shape_cast %29 : vector<4xf32> to vector<4x1xf32>
    %cst_12 = arith.constant dense<0.000000e+00> : vector<1xf32>
    %31 = vector.multi_reduction <add>, %30, %cst_12 [0] : vector<4x1xf32> to vector<1xf32>
    %32 = vector.shape_cast %31 : vector<1xf32> to vector<1x1xf32>
    %33 = arith.addf %15, %32 : vector<1x1xf32>
    %cst_13 = arith.constant dense<0.000000e+00> : vector<4xf32>
    %34 = vector.multi_reduction <add>, %22, %cst_13 [1] : vector<4x128xf32> to vector<4xf32>
    %35 = vector.shape_cast %34 : vector<4xf32> to vector<4x1xf32>
    %cst_14 = arith.constant dense<0.000000e+00> : vector<1xf32>
    %36 = vector.multi_reduction <add>, %35, %cst_14 [0] : vector<4x1xf32> to vector<1xf32>
    %37 = vector.shape_cast %36 : vector<1xf32> to vector<1x1xf32>
    %38 = arith.addf %16, %37 : vector<1x1xf32>
    %c1_i32 = arith.constant 1 : i32
    %c0_15 = arith.constant 0 : index
    %c0_16 = arith.constant 0 : index
    %39 = vector.load %arg5[%c0_15, %c0_16] : memref<1x1xf32, #tpu.memory_space<vmem>>, vector<1x1xf32>
    tpu.vector_store %arg5[%c0_15, %c0_16], %33 {strides = array<i32>} : memref<1x1xf32, #tpu.memory_space<vmem>>, vector<1x1xf32>,
    %c0_17 = arith.constant 0 : index
    %c0_18 = arith.constant 0 : index
    %40 = vector.load %arg6[%c0_17, %c0_18] : memref<1x1xf32, #tpu.memory_space<vmem>>, vector<1x1xf32>
    tpu.vector_store %arg6[%c0_17, %c0_18], %38 {strides = array<i32>} : memref<1x1xf32, #tpu.memory_space<vmem>>, vector<1x1xf32>,
    %c0_i32_19 = arith.constant 0 : i32
    %41 = arith.cmpi eq, %arg1, %c0_i32_19 : i32
    %42 = arith.extui %41 : i1 to i32
    %c0_i32_20 = arith.constant 0 : i32
    %43 = arith.cmpi ne, %42, %c0_i32_20 : i32
    scf.if %43 {
      %c0_21 = arith.constant 0 : index
      %c0_22 = arith.constant 0 : index
      %44 = vector.load %arg5[%c0_21, %c0_22] : memref<1x1xf32, #tpu.memory_space<vmem>>, vector<1x1xf32>
      %cst_23 = arith.constant 3.125000e-02 : f32
      %45 = vector.broadcast %cst_23 : f32 to vector<1x1xf32>
      %46 = arith.mulf %44, %45 : vector<1x1xf32>
      %c0_24 = arith.constant 0 : index
      %c0_25 = arith.constant 0 : index
      %47 = vector.load %arg6[%c0_24, %c0_25] : memref<1x1xf32, #tpu.memory_space<vmem>>, vector<1x1xf32>
      %cst_26 = arith.constant 3.125000e-02 : f32
      %48 = vector.broadcast %cst_26 : f32 to vector<1x1xf32>
      %49 = arith.mulf %47, %48 : vector<1x1xf32>
      %cst_27 = arith.constant 1.000000e-10 : f32
      %50 = vector.broadcast %cst_27 : f32 to vector<1x1xf32>
      %51 = arith.addf %49, %50 : vector<1x1xf32>
      %52 = arith.divf %46, %51 : vector<1x1xf32>
      %53 = math.log %52 : vector<1x1xf32>
      %cst_28 = arith.constant 0.000000e+00 : f32
      %54 = vector.broadcast %cst_28 : f32 to vector<1x1xf32>
      %55 = arith.subf %54, %53 : vector<1x1xf32>
      %c0_29 = arith.constant 0 : index
      %c0_30 = arith.constant 0 : index
      %c0_31 = arith.constant 0 : index
      %56 = vector.load %arg4[%c0_29, %c0_30, %c0_31] : memref<1x1x1xf32, #tpu.memory_space<vmem>>, vector<1x1x1xf32>
      %57 = vector.shape_cast %56 : vector<1x1x1xf32> to vector<1x1xf32>
      %58 = vector.shape_cast %55 : vector<1x1xf32> to vector<1x1x1xf32>
      tpu.vector_store %arg4[%c0_29, %c0_30, %c0_31], %58 {strides = array<i32>} : memref<1x1x1xf32, #tpu.memory_space<vmem>>, vector<1x1x1xf32>,
    } else {
    }
    return
  }
  func.func @transform_0(%arg0: i32, %arg1: i32) -> (i32, i32, i32) {
    %c0_i32 = arith.constant 0 : i32
    %c0_i32_0 = arith.constant 0 : i32
    return %arg0, %arg1, %c0_i32 : i32, i32, i32
  }
  func.func @transform_1(%arg0: i32, %arg1: i32) -> (i32, i32, i32) {
    %c0_i32 = arith.constant 0 : i32
    %c0_i32_0 = arith.constant 0 : i32
    return %arg0, %arg1, %c0_i32 : i32, i32, i32
  }
  func.func @transform_2(%arg0: i32, %arg1: i32) -> (i32, i32, i32) {
    %c0_i32 = arith.constant 0 : i32
    %c0_i32_0 = arith.constant 0 : i32
    %c0_i32_1 = arith.constant 0 : i32
    return %arg0, %c0_i32, %c0_i32_0 : i32, i32, i32
  }
}

</mosaic_0001>

<bundles_post_ra>
// kernel: tpu_custom_call.1
= control target key start
LH: loop header
LB: loop body
LE: loop exit
PB: predicated region body
PF: predicated region fallthrough
CT: control target
= control target key end

     0   :  { %7 = vsyncpa [#allocation5], 0  ;;  %s800_s0 = inlined_call_operand.hbm [shape: s8[2,4,4], index: 0, kind: input, shape index: {}]   ;;  %s801_s1 = inlined_call_operand.hbm [shape: f32[2,4,128], index: 1, kind: input, shape index: {}]   ;;  %s802_s2 = inlined_call_operand.vmem [shape: f32[2,1,1], index: 2, kind: output, shape index: {}]  }
   0x1   :  { %9 = vsyncpa [#allocation5 + $0x1], 0 }
   0x2   :  { %10 = vsyncpa [#allocation7], 0 }
   0x3   :  { %12 = vsyncpa [#allocation7 + $0x1], 0  ;;  %s662_s9 = smov 0   ;;  %s664_s10 = smov 0  }
   0x4   :  { %s666_s11 = smov 0   ;;  %s668_s12 = smov 0  }
   0x5   :  { %s670_s13 = smov 0   ;;  %s672_s14 = smov 0  }
   0x6 LB: > { %s442_s15 = sadd.s32 4294967295, %s641_s14   ;;  %s30_s16 = sadd.s32 1, %s637_s13  ;;  %s641_s14 = sphi %s672_s14, %s18_s14   ;;  %s637_s13 = sphi %s670_s13, %s811_s13   ;;  %s633_s12 = sphi %s668_s12, %s810_s12   ;;  %s629_s11 = sphi %s666_s11, %s809_s11   ;;  %s625_s10 = sphi %s664_s10, %s808_s10   ;;  %s621_s9 = sphi %s662_s9, %s807_s9  }
   0x7   : > { %p32_p0 = scmp.ge.s32.totalorder %s30_s16, 2  ;;  %s39_s17 = sadd.s32 1, %s629_s11 }
   0x8   : > { %p46_p1 = scmp.ne.s32.totalorder %s629_s11, %s625_s10  ;;  %p47_p2 = scmp.eq.s32.totalorder %s641_s14, 0 }
   0x9   : > { %s813_s16 = smov (%p32_p0, %s30_s16), 0  ;;  %p52_p4 = scmp.ne.s32.totalorder %s625_s10, %s621_s9 }
   0xa   : > { %p698_p3 = por %p47_p2, %p46_p1  ;;  %s34_s19 = ssub.s32 %s637_s13, %s813_s16 }
   0xb   : > { %p53_p5 = scmp.eq.s32.totalorder %s442_s15, 0  ;;  %p37_p6 = scmp.eq.s32.totalorder %s34_s19, 0 }
   0xc   : > { %p474_p8 = scmp.lt.s32.totalorder %s641_s14, 2  ;;  %s714_s22 = sand.u32 1, %s629_s11  }
   0xd   : > { %p705_p7 = por %p53_p5, %p52_p4  ;;  %s446_s23 = sshll.u32 %s637_s13, 4 }
   0xe   : > { %s711_s21 = scalar_select %p37_p6, %s629_s11, %s39_s17  }
   0xf   : > { %s139_s26 = scalar_lea.hbm %s800_s0, %s446_s23  ;;  %s133_s27 = scalar_lea.vmem [#allocation4], %s714_s22 }
  0x10   : > { %s141_s28 = sshll.u32 %s133_s27, 4  ;;  %p723_p9 = pnand %p474_p8, %p698_p3  ;;  %s142_s28 = int_to_ptr.vmem [resolvable:$true] %s141_s28 }
  0x11   : > { %p449_p10 = scmp.ge.s32.totalorder %s641_s14, 1  ;;  %p165_p11 = scmp.lt.s32.totalorder %s641_s14, 3 }
  0x12   : > { %s131_s30 = scalar_lea.sflag [#allocation5], %s714_s22  ;;  %p533_p12 = pneg %p723_p9 }
  0x13   : > { %s544_s3 = scalar_lea.vmem %s142_s28, 16  ;;  %s643_s4 = smov [#allocation4]  }
  0x14   : > { %p545_p13 = scmp.ne.s32.totalorder %s142_s28, %s544_s3  ;;  %s549_s5 = sshll.u32 %s643_s4, 4  ;;  %s550_s5 = int_to_ptr.vmem [resolvable:$false] %s549_s5 }
  0x15   : > { %s551_s6 = scalar_lea.vmem %s550_s5, 32  ;;  %p552_p2 = scmp.lt.s32.totalorder %s142_s28, %s550_s5 }
  0x16   : > { %p547_p0 = pnand %p545_p13, %p533_p12  ;;  %p553_p3 = scmp.lt.s32.totalorder %s551_s6, %s544_s3 }
  0x18   : > { %p548_p1 = pneg %p547_p0  ;;  %p554_p4 = por %p553_p3, %p552_p2 }
  0x1a   : > { %p555_p5 = pnand %p554_p4, %p548_p1 }
  0x1c   : > { %558 = shalt.err (!%p555_p5)
}
  0x1d   : > { %470 = dma.hbm_to_vmem [thread:$0]  (!%p723_p9), %s139_s26, 16, %s142_s28, %s131_s30  }
  0x1e   : > { %p741_p6 = pnand %p449_p10, %p165_p11  ;;  %s447_s8 = sshll.u32 %s714_s22, 2 }
  0x1f   : > { %s448_s9 = sshll.u32 %s637_s13, 6  ;;  %s152_s19 = scalar_lea.vmem [#allocation6], %s447_s8 }
  0x20   : > { %s158_s18 = scalar_lea.hbm %s801_s1, %s448_s9  ;;  %s160_s23 = sshll.u32 %s152_s19, 4  ;;  %s161_s23 = int_to_ptr.vmem [resolvable:$true] %s160_s23 }
  0x21   : > { %s149_s24 = scalar_lea.sflag [#allocation7], %s714_s22  ;;  %s572_s25 = scalar_lea.vmem %s161_s23, 64 }
  0x22   : > { %p573_p8 = scmp.ne.s32.totalorder %s161_s23, %s572_s25  ;;  %s644_s26 = smov [#allocation6]  }
  0x23   : > { %s577_s27 = sshll.u32 %s644_s26, 4  ;;  %s578_s27 = int_to_ptr.vmem [resolvable:$false] %s577_s27 }
  0x24   : > { %p575_p13 = pnand %p573_p8, %p533_p12  ;;  %s579_s28 = scalar_lea.vmem %s578_s27, 128 }
  0x25   : > { %p580_p10 = scmp.lt.s32.totalorder %s161_s23, %s578_s27  ;;  %p581_p11 = scmp.lt.s32.totalorder %s579_s28, %s572_s25 }
  0x26   : > { %p576_p0 = pneg %p575_p13 }
  0x27   : > { %p582_p1 = por %p581_p11, %p580_p10 }
  0x29   : > { %p583_p2 = pnand %p582_p1, %p576_p0 }
  0x2b   : > { %586 = shalt.err (!%p583_p2)
}
  0x2c   : > { %473 = dma.hbm_to_vmem [thread:$0]  (!%p723_p9), %s158_s18, 64, %s161_s23, %s149_s24  }
  0x2d   : > { %169 = sbr.rel (%p741_p6) target bundleno = 446 (0x1be), region = 28  ;;  %s171_s22 = sand.u32 (!%p741_p6), 1, %s625_s10  }
  0x2e   : > { %s172_s30 = scalar_lea.sflag (!%p741_p6), [#allocation5], %s171_s22  ;;  %s174_s3 = scalar_lea.vmem (!%p741_p6), [#allocation4], %s171_s22 }
  0x32   : > { %612 = dma.done.wait (%p705_p7), %s172_s30, 16  }
  0x33   : > { %614 = vsyncadd (%p705_p7), %s172_s30, 4294967280  ;;  %s450_s4 = sshll.u32 %s171_s22, 2  ;;  %s180_s5 = scalar_lea.sflag [#allocation7], %s171_s22 }
  0x34   : > { %s183_s6 = scalar_lea.vmem [#allocation6], %s450_s4 }
  0x35   : > { %616 = dma.done.wait (%p705_p7), %s180_s5, 64  }
  0x36   : > { %618 = vsyncadd (%p705_p7), %s180_s5, 4294967232  ;;  %vm213_vm0 = vcmask 0   ;;  %v216_v0 = vlaneseq  ;;  %v645_v1 = vmov 0.0   ;;  %vm646_vm1 = vmmov 0   ;;  %v232_v6 = vld [vmem:[%s174_s3] sm:$0x1] }
  0x37   : > { %214 = vst.msk [vmem:[#allocation2] sm:$0x1] %vm213_vm0, %v645_v1  ;;  %215 = vst.msk [vmem:[#allocation3] sm:$0x1] %vm213_vm0, %v645_v1  ;;  %458 = vmatprep.subr.mxu0 %v645_v1  ;;  %460 = vmatprep.mubr.msk.f32.mxu0 %vm646_vm1, %v645_v1  ;;  %vm239_vm2 = vcmask 1043456   ;;  %v233_v8 = vunpack.c.0.s8 %v232_v6  ;;  %vm235_vm6 = vcmask 31744  }
  0x38   : > { %v217_v2 = vand.u32 127, %v216_v0  ;;  %v219_v3 = vshrl.u32 %v216_v0, 7  ;;  %v229_v7 = vld [vmem:[%s183_s6] sm:$0xf]  ;;  %p206_p7 = scmp.lt.s32.totalorder %s633_s12, 1 }
  0x39   : > { %v230_v9 = vmul.f32 1.442695, %v229_v7  ;;  %v234_v11 = vcvt.s32.f32 %v233_v8 }
  0x3a   : > { %v220_v4 = vmul.u32 32, %v219_v3  ;;  %s815_s12 = smov (!%p206_p7, %s633_s12), 1 }
  0x3b   : > { %525 = vpow2.f32 %v230_v9  ;;  %s208_s7 = scalar_lea.vmem %s802_s2, %s815_s12 }
  0x3c   : > { %v221_v5 = vsub.s32 %v217_v2, %v220_v4 }
  0x3e   : > { %vm222_vm3 = vcmp.ge.s32.totalorder %v221_v5, 0  ;;  %vm223_vm4 = vcmp.lt.s32.totalorder %v221_v5, 32  ;;  %v228_v21 = vld [vmem:[#allocation3] sm:$0x1]  ;;  %v227_v38 = vld [vmem:[#allocation2] sm:$0x1] }
  0x3f   : > { %vm224_vm5 = vmand %vm222_vm3, %vm223_vm4 }
  0x40   : > { %v451_v10 = vsel %vm224_vm5, 1.0, %v645_v1 }
  0x41   : > { %459 = vmatpush3.msk.msra.mxu0 %vm239_vm2, %v451_v10 }
  0x42   : > { %461 = vmatmul.mubr.msk.f32.vlgmr.msra.gmra.mxu0 %vm235_vm6, %v234_v11 }
  0x48   : > { %v526_v12 = vpop.eup %525 }
  0x49   : > { %v325_v13 = vsel %vm239_vm2, %v526_v12, 0.0 }
  0x4a   : > { %326 = vadd.xlane.f32.xlu0 %v325_v13 }
  0xd3   : > { %v327_v14 = vpop.xlane.xlu0 %326 }
  0xd4   : > { %v328_v15 = vsel %vm239_vm2, %v327_v14, 0.0 }
  0xd5   : > { %v329_v16 = vrot.slane %v328_v15, 4 }
  0xd7   : > { %v330_v17 = vadd.f32 %v329_v16, %v328_v15 }
  0xd9   : > { %v331_v18 = vrot.slane %v330_v17, 2 }
  0xdb   : > { %v332_v19 = vadd.f32 %v331_v18, %v330_v17 }
  0xdd   : > { %v333_v20 = vrot.slane %v332_v19, 1 }
  0xdf   : > { %v334_v22 = vadd.f32 %v333_v20, %v332_v19 }
  0xe1   : > { %v335_v23 = vadd.f32 %v334_v22, %v228_v21 }
  0xe3   : > { %338 = vst.msk [vmem:[#allocation3] sm:$0x1] %vm213_vm0, %v335_v23 }
  0xea   : > { %v344_v29 = vld [vmem:[#allocation3] sm:$0x1] }
  0xeb   : > { %v345_v32 = vmul.f32 0.03125, %v344_v29 }
  0xed   : > { %v346_v35 = vadd.f32 1e-10, %v345_v32 }
  0xef   : > { %527 = vrcp.f32 %v346_v35 }
  0xfc   : > { %v528_v43 = vpop.eup %527 }
 0x102   : > { %v309_v24 = vpop.f32.mrf.mxu0 }
 0x103   : > { %v313_v25 = vmul.f32 %v526_v12, %v309_v24 }
 0x104   : > { %v462_v26 = vpop.f32.mrf.mxu0 }
 0x105   : > { %v314_v27 = vsel %vm239_vm2, %v313_v25, 0.0 }
 0x106   : > { %315 = vadd.xlane.f32.xlu0 %v314_v27 }
 0x18f   : > { %v316_v28 = vpop.xlane.xlu0 %315 }
 0x190   : > { %v317_v30 = vsel %vm239_vm2, %v316_v28, 0.0 }
 0x191   : > { %v318_v31 = vrot.slane %v317_v30, 4 }
 0x193   : > { %v319_v33 = vadd.f32 %v318_v31, %v317_v30 }
 0x195   : > { %v320_v34 = vrot.slane %v319_v33, 2 }
 0x197   : > { %v321_v36 = vadd.f32 %v320_v34, %v319_v33 }
 0x199   : > { %v322_v37 = vrot.slane %v321_v36, 1 }
 0x19b   : > { %v323_v39 = vadd.f32 %v322_v37, %v321_v36 }
 0x19d   : > { %v324_v40 = vadd.f32 %v323_v39, %v227_v38 }
 0x19f   : > { %337 = vst.msk [vmem:[#allocation2] sm:$0x1] %vm213_vm0, %v324_v40 }
 0x1a6   : > { %v342_v41 = vld [vmem:[#allocation2] sm:$0x1] }
 0x1a7   : > { %v343_v42 = vmul.f32 0.03125, %v342_v41 }
 0x1a9   : > { %v348_v44 = vmul.f32 %v528_v43, %v343_v42 }
 0x1ab   : > { %529 = vlog2.f32 %v348_v44 }
 0x1b8   : > { %v530_v45 = vpop.eup %529 }
 0x1b9   : > { %v350_v46 = vmul.f32 0.6931472, %v530_v45 }
 0x1bb   : > { %v351_v47 = vsub.f32 0.0, %v350_v46 }
 0x1bd   : > { %352 = vst.msk [vmem:[%s208_s7] sm:$0x1] %vm213_vm0, %v351_v47 }
 0x1be PF: > { %s18_s14 = sadd.s32 1, %s641_s14   ;;  %s807_s9 = smov %s625_s10 }
 0x1bf   : > { %p15_p9 = scmp.ge.s32.totalorder %s18_s14, 4   ;;  %s808_s10 = smov %s629_s11 }
 0x1c0   : > { %s809_s11 = smov %s711_s21  ;;  %s810_s12 = smov %s637_s13 }
 0x1c1   : > { %s811_s13 = smov %s813_s16  ;;  %17 = sbr.rel (!%p15_p9) target bundleno = 6 (0x6), region = 89 }
 0x1c6   :  { %370 = vsyncpa [#allocation5], 1 }
 0x1c7   :  { %372 = vsyncpa [#allocation5 + $0x1], 1 }
 0x1c8   :  { %373 = vsyncpa [#allocation7], 1 }
 0x1c9   :  { %375 = vsyncpa [#allocation7 + $0x1], 1 }

</bundles_post_ra>
